<compile_context>
chip_gen: v6e
topology: v6e:2x2x1
jax: 0.10.0
libtpu: 0.0.40
codegen_flags: <defaults>
</compile_context>

<pallas_src>
import functools
import math

import jax
import jax.numpy as jnp
from jax import lax
from jax.experimental import pallas as pl
from jax.experimental.pallas import tpu as pltpu

# anchor channel indices (bip3d euler-box convention)
X, Y, Z, W, L, H, ALPHA, BETA, GAMMA = range(9)


def _round_up(x, m):
    return ((x + m - 1) // m) * m


def _cdiv(a, b):
    return -(-a // b)


def _keypoints_kernel(*refs, num_fix, num_learnable_pts):
    """One lane-tile of instances (instances on the 128-lane axis).

    learnable path : refs = (anchor, fix, feat, w, b, out_x, out_y, out_z)
    fixed-only     : refs = (anchor, fix,             out_x, out_y, out_z)

    anchor rows are pre-ordered (W, L, H, ALPHA, BETA, GAMMA, X, Y, Z).
    """
    if num_learnable_pts > 0:
        anchor_ref, fix_ref, feat_ref, w_ref, b_ref, ox_ref, oy_ref, oz_ref = refs
    else:
        anchor_ref, fix_ref, ox_ref, oy_ref, oz_ref = refs
        feat_ref = w_ref = b_ref = None

    anchor = anchor_ref[...]                               # [9, T] f32, lane-dense

    # sizes = exp([W, L, H])  — rows 0:3, one sublane group
    size = jnp.exp(anchor[0:3, :])                         # [3, T]
    sx, sy, sz = size[0:1, :], size[1:2, :], size[2:3, :]

    # Euler angles rows 3:6; single cos pass, sin(x) == cos(x - pi/2)
    ang = anchor[3:6, :]                                   # [3, T]
    cc = jnp.cos(jnp.concatenate([ang, ang - (math.pi / 2.0)], axis=0))   # [6, T]
    ca, cb, cg = cc[0:1, :], cc[1:2, :], cc[2:3, :]
    sa, sb, sg = cc[3:4, :], cc[4:5, :], cc[5:6, :]

    # R = Rz(alpha) @ Rx(beta) @ Ry(gamma); points_new = points @ R^T
    r00 = ca * cg - sa * sb * sg
    r01 = -sa * cb
    r02 = ca * sg + sa * sb * cg
    r10 = sa * cg + ca * sb * sg
    r11 = ca * cb
    r12 = sa * sg - ca * sb * cg
    r20 = -cb * sg
    r21 = sb
    r22 = cb * cg

    cx = anchor[6:7, :]
    cy = anchor[7:8, :]
    cz = anchor[8:9, :]

    # fixed-scale key points: [F,1] * [1,T] -> [F,T]
    nf = num_fix
    fs = fix_ref[...]                                      # [3F, 1], plane-major
    kx = fs[0 * nf:1 * nf] * sx
    ky = fs[1 * nf:2 * nf] * sy
    kz = fs[2 * nf:3 * nf] * sz

    if num_learnable_pts > 0:
        nl = num_learnable_pts
        # [3L, E] x [T, E]^T on the MXU (f32 accumulate); rows are coordinate-major,
        # feature stays in its native [T, E] layout.
        fc = lax.dot_general(
            w_ref[...], feat_ref[...],
            dimension_numbers=(((1,), (1,)), ((), ())),
            preferred_element_type=jnp.float32) + b_ref[...]          # [3L, T]
        # sigmoid(x) - 0.5 == 0.5 * tanh(x / 2)  (numerically stable)
        learn = 0.5 * jnp.tanh(0.5 * fc)
        kx = jnp.concatenate([kx, learn[0 * nl:1 * nl, :] * sx], axis=0)
        ky = jnp.concatenate([ky, learn[1 * nl:2 * nl, :] * sy], axis=0)
        kz = jnp.concatenate([kz, learn[2 * nl:3 * nl, :] * sz], axis=0)

    # dense per-plane stores, each [P, T]
    ox_ref[...] = r00 * kx + r01 * ky + r02 * kz + cx
    oy_ref[...] = r10 * kx + r11 * ky + r12 * kz + cy
    oz_ref[...] = r20 * kx + r21 * ky + r22 * kz + cz


class SparseBox3DKeyPointsGenerator:
    """JAX/Pallas port of the PyTorch module (main forward path)."""

    def __init__(self, embed_dims=256, num_learnable_pts=0, fix_scale=None, *,
                 key=None, tile_n=8192, vmem_limit_bytes=48 * 1024 * 1024):
        assert tile_n % 128 == 0
        self.embed_dims = embed_dims
        self.num_learnable_pts = num_learnable_pts
        self.tile_n = tile_n
        self.vmem_limit_bytes = vmem_limit_bytes
        if fix_scale is None:
            fix_scale = ((0.0, 0.0, 0.0),)
        self.fix_scale = tuple(tuple(float(v) for v in row) for row in fix_scale)
        self.num_pts = len(self.fix_scale) + num_learnable_pts

        nf = len(self.fix_scale)
        fs = jnp.asarray(self.fix_scale, jnp.float32)      # [F, 3]
        # plane-major column vector: all x scales, then y, then z -> [3F, 1]
        self.fix_arr = fs.T.reshape(3 * nf, 1)

        if num_learnable_pts > 0:
            assert key is not None
            k_w, k_b = jax.random.split(key)
            bound = 1.0 / math.sqrt(embed_dims)
            # Reference-layout params (torch.nn.Linear, stored transposed):
            #   w: [E, 3L]  (column j = point j//3, coord j%3),  b: [3L]
            self.w = jax.random.uniform(k_w, (embed_dims, num_learnable_pts * 3),
                                        jnp.float32, -bound, bound)
            self.b = jax.random.uniform(k_b, (num_learnable_pts * 3,),
                                        jnp.float32, -bound, bound)
            # Kernel-layout params: coordinate-major rows (x rows, then y, then z),
            # kept in f32 (FLOPs are hidden under the feature DMA anyway).
            npts, e = num_learnable_pts, embed_dims
            self.w_k = (self.w.T.reshape(npts, 3, e)
                        .transpose(1, 0, 2)
                        .reshape(3 * npts, e))
            self.b_k = self.b.reshape(npts, 3).T.reshape(3 * npts, 1)
        else:
            self.w = self.b = self.w_k = self.b_k = None

    def __call__(self, anchor, instance_feature=None):
        bs, num_anchor = anchor.shape[:2]
        n = bs * num_anchor
        use_learn = self.num_learnable_pts > 0 and instance_feature is not None
        nf = len(self.fix_scale)
        nl = self.num_learnable_pts if use_learn else 0
        num_out_pts = nf + nl

        # channel-reordered, instance-on-lane anchor: rows (W,L,H,ALPHA,BETA,GAMMA,X,Y,Z)
        a9 = anchor.reshape(n, anchor.shape[-1])[:, :9].astype(jnp.float32).T  # [9, n]
        anchor_t = jnp.concatenate([a9[3:9], a9[0:3]], axis=0)                 # [9, n]

        # Tile / grid selection: pad only the tiny anchor; keep >=2 grid steps when
        # there is enough work so "parallel" can shard across v7x's two TensorCores.
        n_lane = _round_up(max(n, 1), 128)
        tile = min(self.tile_n, n_lane)
        if n_lane >= 256:
            tile = min(tile, _round_up(_cdiv(n_lane, 2), 128))
        num_steps = _cdiv(n_lane, tile)
        n_pad = num_steps * tile
        if n_pad != n:
            anchor_t = jnp.pad(anchor_t, ((0, 0), (0, n_pad - n)))

        kernel = functools.partial(_keypoints_kernel, num_fix=nf,
                                   num_learnable_pts=nl)
        in_specs = [
            pl.BlockSpec((9, tile), lambda i: (0, i)),
            pl.BlockSpec((3 * nf, 1), lambda i: (0, 0)),
        ]
        args = [anchor_t, self.fix_arr]
        if use_learn:
            e = self.embed_dims
            # Native [N, E] f32 layout, no transpose / cast / pad HBM passes.
            # Ragged tails are handled by the (masked / padded) boundary block.
            feat = instance_feature.reshape(n, e).astype(jnp.float32)
            in_specs += [
                pl.BlockSpec((tile, e), lambda i: (i, 0)),
                pl.BlockSpec((3 * nl, e), lambda i: (0, 0)),
                pl.BlockSpec((3 * nl, 1), lambda i: (0, 0)),
            ]
            args += [feat, self.w_k, self.b_k]

        plane = jax.ShapeDtypeStruct((num_out_pts, n_pad), jnp.float32)
        out_spec = pl.BlockSpec((num_out_pts, tile), lambda i: (0, i))

        ox, oy, oz = pl.pallas_call(
            kernel,
            out_shape=(plane, plane, plane),
            grid=(num_steps,),
            in_specs=in_specs,
            out_specs=(out_spec, out_spec, out_spec),
            compiler_params=pltpu.CompilerParams(
                dimension_semantics=("parallel",),
                vmem_limit_bytes=self.vmem_limit_bytes),
        )(*args)

        # TODO(synk): consumers that accept plane-major [3, P, N] output could skip
        # this final transpose (an extra HBM pass over the result).
        out = jnp.stack([ox[:, :n], oy[:, :n], oz[:, :n]], axis=-1)     # [P, n, 3]
        return jnp.swapaxes(out, 0, 1).reshape(bs, num_anchor, num_out_pts, 3)


# ---------------------------------------------------------------------------
# plain-JAX reference (mirrors the PyTorch forward) used for correctness checks
# ---------------------------------------------------------------------------
def _axis_rot(axis, t):
    c, s = jnp.cos(t), jnp.sin(t)
    o, z = jnp.ones_like(t), jnp.zeros_like(t)
    if axis == "X":
        rows = ((o, z, z), (z, c, -s), (z, s, c))
    elif axis == "Y":
        rows = ((c, z, s), (z, o, z), (-s, z, c))
    else:  # Z
        rows = ((c, -s, z), (s, c, z), (z, z, o))
    return jnp.stack([jnp.stack(r, -1) for r in rows], -2)


def reference(anchor, instance_feature, fix_scale, w, b, num_learnable_pts):
    bs, num_anchor = anchor.shape[:2]
    size = jnp.exp(anchor[..., 3:6])[:, :, None, :]                 # [bs,A,1,3]
    fix = jnp.asarray(fix_scale, jnp.float32)                       # [F,3]
    kp = fix[None, None] * size                                     # [bs,A,F,3]
    if num_learnable_pts > 0:
        ls = jax.nn.sigmoid(instance_feature @ w + b.reshape(-1))
        ls = ls.reshape(bs, num_anchor, num_learnable_pts, 3) - 0.5
        kp = jnp.concatenate([kp, ls * size], axis=-2)
    a, bb, g = anchor[..., 6], anchor[..., 7], anchor[..., 8]
    rot = _axis_rot("Z", a) @ _axis_rot("X", bb) @ _axis_rot("Y", g)  # [bs,A,3,3]
    kp = jnp.einsum("bapj,baij->bapi", kp, rot)                     # points @ R^T
    kp = kp + anchor[..., None, 0:3]
    return kp


if __name__ == "__main__":
    key = jax.random.PRNGKey(0)
    k_anchor, k_feat, k_params = jax.random.split(key, 3)

    bs, num_anchor, embed_dims, num_learnable_pts = 2, 128, 32, 2
    fix_scale = (
        (0.0, 0.0, 0.0),
        (0.45, 0.0, 0.0),
        (-0.45, 0.0, 0.0),
        (0.0, 0.45, 0.0),
        (0.0, -0.45, 0.0),
        (0.0, 0.0, 0.45),
        (0.0, 0.0, -0.45),
    )

    # tile_n=128 so the small test still exercises the grid / pipeline (n=256 -> 2 tiles)
    module = SparseBox3DKeyPointsGenerator(
        embed_dims=embed_dims,
        num_learnable_pts=num_learnable_pts,
        fix_scale=fix_scale,
        key=k_params,
        tile_n=128,
    )

    # anchor: [bs, num_anchor, 9] = (X,Y,Z,W,L,H,ALPHA,BETA,GAMMA)
    anchor = 0.5 * jax.random.normal(k_anchor, (bs, num_anchor, 9), jnp.float32)
    instance_feature = jax.random.normal(
        k_feat, (bs, num_anchor, embed_dims), jnp.float32)

    # learnable-points path (all-f32 matmul)
    key_points = jax.block_until_ready(module(anchor, instance_feature))
    ref = reference(anchor, instance_feature, fix_scale, module.w, module.b,
                    num_learnable_pts)
    assert key_points.shape == (bs, num_anchor, len(fix_scale) + num_learnable_pts, 3)
    err = float(jnp.max(jnp.abs(key_points - ref)))
    assert jnp.allclose(key_points, ref, atol=1e-3, rtol=1e-3), err

    # fixed-scale-only path (instance_feature=None): feature/weight inputs dropped
    kp_fix = jax.block_until_ready(module(anchor))
    ref_fix = reference(anchor, None, fix_scale, None, None, 0)
    assert kp_fix.shape == (bs, num_anchor, len(fix_scale), 3)
    assert jnp.allclose(kp_fix, ref_fix, atol=1e-4, rtol=1e-4), (
        float(jnp.max(jnp.abs(kp_fix - ref_fix))))

    # ragged N: feature stays unpadded; the boundary block handles the tail
    bs2, na2 = 2, 100
    anchor2 = 0.5 * jax.random.normal(jax.random.PRNGKey(1), (bs2, na2, 9), jnp.float32)
    feat2 = jax.random.normal(jax.random.PRNGKey(2), (bs2, na2, embed_dims), jnp.float32)
    kp2 = jax.block_until_ready(module(anchor2, feat2))
    ref2 = reference(anchor2, feat2, fix_scale, module.w, module.b, num_learnable_pts)
    assert kp2.shape == (bs2, na2, len(fix_scale) + num_learnable_pts, 3)
    assert jnp.allclose(kp2, ref2, atol=1e-3, rtol=1e-3), (
        float(jnp.max(jnp.abs(kp2 - ref2))))

    print("KERNEL_OK")
</pallas_src>

<mosaic_0001>
module attributes {stable_mosaic.version = 11 : i64} {
  func.func @_keypoints_kernel(%arg0: i32, %arg1: memref<9x128xf32, #tpu.memory_space<vmem>>, %arg2: memref<21x1xf32, #tpu.memory_space<vmem>>, %arg3: memref<128x32xf32, #tpu.memory_space<vmem>>, %arg4: memref<6x32xf32, #tpu.memory_space<vmem>>, %arg5: memref<6x1xf32, #tpu.memory_space<vmem>>, %arg6: memref<9x128xf32, #tpu.memory_space<vmem>>, %arg7: memref<9x128xf32, #tpu.memory_space<vmem>>, %arg8: memref<9x128xf32, #tpu.memory_space<vmem>>) attributes {dimension_semantics = [#tpu.dimension_semantics<parallel>], iteration_bounds = array<i64: 2>, scalar_prefetch = 0 : i64, scratch_operands = 0 : i64, tpu.core_type = #tpu.core_type<tc>, window_params = [{transform_indices = @transform_0, window_bounds = array<i64: 9, 128>}, {pipeline_mode = #tpu.pipeline_mode<synchronous>, transform_indices = @transform_1, window_bounds = array<i64: 21, 1>}, {transform_indices = @transform_2, window_bounds = array<i64: 128, 32>}, {pipeline_mode = #tpu.pipeline_mode<synchronous>, transform_indices = @transform_3, window_bounds = array<i64: 6, 32>}, {pipeline_mode = #tpu.pipeline_mode<synchronous>, transform_indices = @transform_4, window_bounds = array<i64: 6, 1>}, {transform_indices = @transform_5, window_bounds = array<i64: 9, 128>}, {transform_indices = @transform_6, window_bounds = array<i64: 9, 128>}, {transform_indices = @transform_7, window_bounds = array<i64: 9, 128>}]} {
    %c0 = arith.constant 0 : index
    %c0_0 = arith.constant 0 : index
    %0 = vector.load %arg1[%c0, %c0_0] : memref<9x128xf32, #tpu.memory_space<vmem>>, vector<9x128xf32>
    %1 = vector.extract_strided_slice %0 {offsets = [0, 0], sizes = [3, 128], strides = [1, 1]} : vector<9x128xf32> to vector<3x128xf32>
    %2 = math.exp %1 : vector<3x128xf32>
    %3 = vector.extract_strided_slice %2 {offsets = [0, 0], sizes = [1, 128], strides = [1, 1]} : vector<3x128xf32> to vector<1x128xf32>
    %4 = vector.extract_strided_slice %2 {offsets = [1, 0], sizes = [1, 128], strides = [1, 1]} : vector<3x128xf32> to vector<1x128xf32>
    %5 = vector.extract_strided_slice %2 {offsets = [2, 0], sizes = [1, 128], strides = [1, 1]} : vector<3x128xf32> to vector<1x128xf32>
    %6 = vector.extract_strided_slice %0 {offsets = [3, 0], sizes = [3, 128], strides = [1, 1]} : vector<9x128xf32> to vector<3x128xf32>
    %cst = arith.constant 1.57079637 : f32
    %7 = vector.broadcast %cst : f32 to vector<3x128xf32>
    %8 = arith.subf %6, %7 : vector<3x128xf32>
    %9 = tpu.concatenate %6, %8 in 0 : vector<3x128xf32>, vector<3x128xf32> -> vector<6x128xf32>
    %10 = math.cos %9 : vector<6x128xf32>
    %11 = vector.extract_strided_slice %10 {offsets = [0, 0], sizes = [1, 128], strides = [1, 1]} : vector<6x128xf32> to vector<1x128xf32>
    %12 = vector.extract_strided_slice %10 {offsets = [1, 0], sizes = [1, 128], strides = [1, 1]} : vector<6x128xf32> to vector<1x128xf32>
    %13 = vector.extract_strided_slice %10 {offsets = [2, 0], sizes = [1, 128], strides = [1, 1]} : vector<6x128xf32> to vector<1x128xf32>
    %14 = vector.extract_strided_slice %10 {offsets = [3, 0], sizes = [1, 128], strides = [1, 1]} : vector<6x128xf32> to vector<1x128xf32>
    %15 = vector.extract_strided_slice %10 {offsets = [4, 0], sizes = [1, 128], strides = [1, 1]} : vector<6x128xf32> to vector<1x128xf32>
    %16 = vector.extract_strided_slice %10 {offsets = [5, 0], sizes = [1, 128], strides = [1, 1]} : vector<6x128xf32> to vector<1x128xf32>
    %17 = arith.mulf %11, %13 : vector<1x128xf32>
    %18 = arith.mulf %14, %15 : vector<1x128xf32>
    %19 = arith.mulf %18, %16 : vector<1x128xf32>
    %20 = arith.subf %17, %19 : vector<1x128xf32>
    %cst_1 = arith.constant 0.000000e+00 : f32
    %21 = vector.broadcast %cst_1 : f32 to vector<1x128xf32>
    %22 = arith.subf %21, %14 : vector<1x128xf32>
    %23 = arith.mulf %22, %12 : vector<1x128xf32>
    %24 = arith.mulf %11, %16 : vector<1x128xf32>
    %25 = arith.mulf %14, %15 : vector<1x128xf32>
    %26 = arith.mulf %25, %13 : vector<1x128xf32>
    %27 = arith.addf %24, %26 : vector<1x128xf32>
    %28 = arith.mulf %14, %13 : vector<1x128xf32>
    %29 = arith.mulf %11, %15 : vector<1x128xf32>
    %30 = arith.mulf %29, %16 : vector<1x128xf32>
    %31 = arith.addf %28, %30 : vector<1x128xf32>
    %32 = arith.mulf %11, %12 : vector<1x128xf32>
    %33 = arith.mulf %14, %16 : vector<1x128xf32>
    %34 = arith.mulf %11, %15 : vector<1x128xf32>
    %35 = arith.mulf %34, %13 : vector<1x128xf32>
    %36 = arith.subf %33, %35 : vector<1x128xf32>
    %cst_2 = arith.constant 0.000000e+00 : f32
    %37 = vector.broadcast %cst_2 : f32 to vector<1x128xf32>
    %38 = arith.subf %37, %12 : vector<1x128xf32>
    %39 = arith.mulf %38, %16 : vector<1x128xf32>
    %40 = arith.mulf %12, %13 : vector<1x128xf32>
    %41 = vector.extract_strided_slice %0 {offsets = [6, 0], sizes = [1, 128], strides = [1, 1]} : vector<9x128xf32> to vector<1x128xf32>
    %42 = vector.extract_strided_slice %0 {offsets = [7, 0], sizes = [1, 128], strides = [1, 1]} : vector<9x128xf32> to vector<1x128xf32>
    %43 = vector.extract_strided_slice %0 {offsets = [8, 0], sizes = [1, 128], strides = [1, 1]} : vector<9x128xf32> to vector<1x128xf32>
    %c0_3 = arith.constant 0 : index
    %c0_4 = arith.constant 0 : index
    %44 = vector.load %arg2[%c0_3, %c0_4] : memref<21x1xf32, #tpu.memory_space<vmem>>, vector<21x1xf32>
    %45 = vector.extract_strided_slice %44 {offsets = [0, 0], sizes = [7, 1], strides = [1, 1]} : vector<21x1xf32> to vector<7x1xf32>
    %46 = vector.broadcast %45 : vector<7x1xf32> to vector<7x128xf32>
    %47 = vector.broadcast %3 : vector<1x128xf32> to vector<7x128xf32>
    %48 = arith.mulf %46, %47 : vector<7x128xf32>
    %49 = vector.extract_strided_slice %44 {offsets = [7, 0], sizes = [7, 1], strides = [1, 1]} : vector<21x1xf32> to vector<7x1xf32>
    %50 = vector.broadcast %49 : vector<7x1xf32> to vector<7x128xf32>
    %51 = vector.broadcast %4 : vector<1x128xf32> to vector<7x128xf32>
    %52 = arith.mulf %50, %51 : vector<7x128xf32>
    %53 = vector.extract_strided_slice %44 {offsets = [14, 0], sizes = [7, 1], strides = [1, 1]} : vector<21x1xf32> to vector<7x1xf32>
    %54 = vector.broadcast %53 : vector<7x1xf32> to vector<7x128xf32>
    %55 = vector.broadcast %5 : vector<1x128xf32> to vector<7x128xf32>
    %56 = arith.mulf %54, %55 : vector<7x128xf32>
    %c0_5 = arith.constant 0 : index
    %c0_6 = arith.constant 0 : index
    %57 = vector.load %arg4[%c0_5, %c0_6] : memref<6x32xf32, #tpu.memory_space<vmem>>, vector<6x32xf32>
    %c0_7 = arith.constant 0 : index
    %c0_8 = arith.constant 0 : index
    %58 = vector.load %arg3[%c0_7, %c0_8] : memref<128x32xf32, #tpu.memory_space<vmem>>, vector<128x32xf32>
    %cst_9 = arith.constant dense<0.000000e+00> : vector<6x128xf32>
    %59 = tpu.matmul %57, %58, %cst_9 {dimension_numbers = #tpu.dot_dimension_numbers<[1], [1], [0], [0], [0, 0, 1, 0], [], []>} : vector<6x32xf32>, vector<128x32xf32>, vector<6x128xf32> -> vector<6x128xf32>
    %c0_10 = arith.constant 0 : index
    %c0_11 = arith.constant 0 : index
    %60 = vector.load %arg5[%c0_10, %c0_11] : memref<6x1xf32, #tpu.memory_space<vmem>>, vector<6x1xf32>
    %61 = vector.broadcast %60 : vector<6x1xf32> to vector<6x128xf32>
    %62 = arith.addf %59, %61 : vector<6x128xf32>
    %cst_12 = arith.constant 5.000000e-01 : f32
    %63 = vector.broadcast %cst_12 : f32 to vector<6x128xf32>
    %64 = arith.mulf %63, %62 : vector<6x128xf32>
    %65 = math.tanh %64 : vector<6x128xf32>
    %cst_13 = arith.constant 5.000000e-01 : f32
    %66 = vector.broadcast %cst_13 : f32 to vector<6x128xf32>
    %67 = arith.mulf %66, %65 : vector<6x128xf32>
    %68 = vector.extract_strided_slice %67 {offsets = [0, 0], sizes = [2, 128], strides = [1, 1]} : vector<6x128xf32> to vector<2x128xf32>
    %69 = vector.broadcast %3 : vector<1x128xf32> to vector<2x128xf32>
    %70 = arith.mulf %68, %69 : vector<2x128xf32>
    %71 = tpu.concatenate %48, %70 in 0 : vector<7x128xf32>, vector<2x128xf32> -> vector<9x128xf32>
    %72 = vector.extract_strided_slice %67 {offsets = [2, 0], sizes = [2, 128], strides = [1, 1]} : vector<6x128xf32> to vector<2x128xf32>
    %73 = vector.broadcast %4 : vector<1x128xf32> to vector<2x128xf32>
    %74 = arith.mulf %72, %73 : vector<2x128xf32>
    %75 = tpu.concatenate %52, %74 in 0 : vector<7x128xf32>, vector<2x128xf32> -> vector<9x128xf32>
    %76 = vector.extract_strided_slice %67 {offsets = [4, 0], sizes = [2, 128], strides = [1, 1]} : vector<6x128xf32> to vector<2x128xf32>
    %77 = vector.broadcast %5 : vector<1x128xf32> to vector<2x128xf32>
    %78 = arith.mulf %76, %77 : vector<2x128xf32>
    %79 = tpu.concatenate %56, %78 in 0 : vector<7x128xf32>, vector<2x128xf32> -> vector<9x128xf32>
    %80 = vector.broadcast %20 : vector<1x128xf32> to vector<9x128xf32>
    %81 = arith.mulf %80, %71 : vector<9x128xf32>
    %82 = vector.broadcast %23 : vector<1x128xf32> to vector<9x128xf32>
    %83 = arith.mulf %82, %75 : vector<9x128xf32>
    %84 = arith.addf %81, %83 : vector<9x128xf32>
    %85 = vector.broadcast %27 : vector<1x128xf32> to vector<9x128xf32>
    %86 = arith.mulf %85, %79 : vector<9x128xf32>
    %87 = arith.addf %84, %86 : vector<9x128xf32>
    %88 = vector.broadcast %41 : vector<1x128xf32> to vector<9x128xf32>
    %89 = arith.addf %87, %88 : vector<9x128xf32>
    %c0_14 = arith.constant 0 : index
    %c0_15 = arith.constant 0 : index
    %90 = vector.load %arg6[%c0_14, %c0_15] : memref<9x128xf32, #tpu.memory_space<vmem>>, vector<9x128xf32>
    tpu.vector_store %arg6[%c0_14, %c0_15], %89 {strides = array<i32>} : memref<9x128xf32, #tpu.memory_space<vmem>>, vector<9x128xf32>,
    %91 = vector.broadcast %31 : vector<1x128xf32> to vector<9x128xf32>
    %92 = arith.mulf %91, %71 : vector<9x128xf32>
    %93 = vector.broadcast %32 : vector<1x128xf32> to vector<9x128xf32>
    %94 = arith.mulf %93, %75 : vector<9x128xf32>
    %95 = arith.addf %92, %94 : vector<9x128xf32>
    %96 = vector.broadcast %36 : vector<1x128xf32> to vector<9x128xf32>
    %97 = arith.mulf %96, %79 : vector<9x128xf32>
    %98 = arith.addf %95, %97 : vector<9x128xf32>
    %99 = vector.broadcast %42 : vector<1x128xf32> to vector<9x128xf32>
    %100 = arith.addf %98, %99 : vector<9x128xf32>
    %c0_16 = arith.constant 0 : index
    %c0_17 = arith.constant 0 : index
    %101 = vector.load %arg7[%c0_16, %c0_17] : memref<9x128xf32, #tpu.memory_space<vmem>>, vector<9x128xf32>
    tpu.vector_store %arg7[%c0_16, %c0_17], %100 {strides = array<i32>} : memref<9x128xf32, #tpu.memory_space<vmem>>, vector<9x128xf32>,
    %102 = vector.broadcast %39 : vector<1x128xf32> to vector<9x128xf32>
    %103 = arith.mulf %102, %71 : vector<9x128xf32>
    %104 = vector.broadcast %15 : vector<1x128xf32> to vector<9x128xf32>
    %105 = arith.mulf %104, %75 : vector<9x128xf32>
    %106 = arith.addf %103, %105 : vector<9x128xf32>
    %107 = vector.broadcast %40 : vector<1x128xf32> to vector<9x128xf32>
    %108 = arith.mulf %107, %79 : vector<9x128xf32>
    %109 = arith.addf %106, %108 : vector<9x128xf32>
    %110 = vector.broadcast %43 : vector<1x128xf32> to vector<9x128xf32>
    %111 = arith.addf %109, %110 : vector<9x128xf32>
    %c0_18 = arith.constant 0 : index
    %c0_19 = arith.constant 0 : index
    %112 = vector.load %arg8[%c0_18, %c0_19] : memref<9x128xf32, #tpu.memory_space<vmem>>, vector<9x128xf32>
    tpu.vector_store %arg8[%c0_18, %c0_19], %111 {strides = array<i32>} : memref<9x128xf32, #tpu.memory_space<vmem>>, vector<9x128xf32>,
    return
  }
  func.func @transform_0(%arg0: i32) -> (i32, i32) {
    %c0_i32 = arith.constant 0 : i32
    %c0_i32_0 = arith.constant 0 : i32
    return %c0_i32, %arg0 : i32, i32
  }
  func.func @transform_1(%arg0: i32) -> (i32, i32) {
    %c0_i32 = arith.constant 0 : i32
    %c0_i32_0 = arith.constant 0 : i32
    %c0_i32_1 = arith.constant 0 : i32
    return %c0_i32, %c0_i32_0 : i32, i32
  }
  func.func @transform_2(%arg0: i32) -> (i32, i32) {
    %c0_i32 = arith.constant 0 : i32
    %c0_i32_0 = arith.constant 0 : i32
    return %arg0, %c0_i32 : i32, i32
  }
  func.func @transform_3(%arg0: i32) -> (i32, i32) {
    %c0_i32 = arith.constant 0 : i32
    %c0_i32_0 = arith.constant 0 : i32
    %c0_i32_1 = arith.constant 0 : i32
    return %c0_i32, %c0_i32_0 : i32, i32
  }
  func.func @transform_4(%arg0: i32) -> (i32, i32) {
    %c0_i32 = arith.constant 0 : i32
    %c0_i32_0 = arith.constant 0 : i32
    %c0_i32_1 = arith.constant 0 : i32
    return %c0_i32, %c0_i32_0 : i32, i32
  }
  func.func @transform_5(%arg0: i32) -> (i32, i32) {
    %c0_i32 = arith.constant 0 : i32
    %c0_i32_0 = arith.constant 0 : i32
    return %c0_i32, %arg0 : i32, i32
  }
  func.func @transform_6(%arg0: i32) -> (i32, i32) {
    %c0_i32 = arith.constant 0 : i32
    %c0_i32_0 = arith.constant 0 : i32
    return %c0_i32, %arg0 : i32, i32
  }
  func.func @transform_7(%arg0: i32) -> (i32, i32) {
    %c0_i32 = arith.constant 0 : i32
    %c0_i32_0 = arith.constant 0 : i32
    return %c0_i32, %arg0 : i32, i32
  }
}

</mosaic_0001>

<bundles_post_ra>
// kernel: tpu_custom_call.1
= control target key start
LH: loop header
LB: loop body
LE: loop exit
PB: predicated region body
PF: predicated region fallthrough
CT: control target
= control target key end

     0   :  { %s1711_s0 = inlined_call_operand.vmem [shape: f32[9,256], index: 0, kind: input, shape index: {}]   ;;  %s1712_s1 = inlined_call_operand.vmem [shape: f32[21,1], index: 1, kind: input, shape index: {}]   ;;  %s1713_s2 = inlined_call_operand.vmem [shape: f32[256,32], index: 2, kind: input, shape index: {}]   ;;  %s1714_s3 = inlined_call_operand.vmem [shape: f32[6,32], index: 3, kind: input, shape index: {}]   ;;  %s1715_s4 = inlined_call_operand.vmem [shape: f32[6,1], index: 4, kind: input, shape index: {}]   ;;  %s1716_s5 = inlined_call_operand.hbm [shape: f32[9,256], index: 5, kind: output, shape index: {0}]   ;;  %s1717_s6 = inlined_call_operand.hbm [shape: f32[9,256], index: 6, kind: output, shape index: {1}]   ;;  %s1718_s7 = inlined_call_operand.hbm [shape: f32[9,256], index: 7, kind: output, shape index: {2}]  }
   0x1   :  { %1720 = sst [smem:[#allocation10_spill]] %s1711_s0 }
   0x2   :  { %1721 = sst [smem:[#allocation11_spill]] %s1712_s1 }
   0x3   :  { %1722 = sst [smem:[#allocation12_spill]] %s1713_s2 }
   0x4   :  { %1723 = sst [smem:[#allocation13_spill]] %s1714_s3 }
   0x5   :  { %13 = vsyncpa [#allocation4], 0 }
   0x6   :  { %15 = vsyncpa [#allocation4 + $0x1], 0 }
   0x7   :  { %16 = vsyncpa [#allocation6], 0 }
   0x8   :  { %18 = vsyncpa [#allocation6 + $0x1], 0  ;;  %s1350_s24 = smov 0   ;;  %s1352_s25 = smov 0  }
   0x9   :  { %s1354_s26 = smov 0   ;;  %s1356_s27 = smov 0  }
   0xa LB: > { %s1371_s28 = sadd.s32 4294967295, %s1293_s27   ;;  %s1719_s29 = sadd.s32 4294967294, %s1293_s27   ;;  %s1293_s27 = sphi %s1356_s27, %s1736_s27   ;;  %s1289_s26 = sphi %s1354_s26, %s1735_s26   ;;  %s1285_s25 = sphi %s1352_s25, %s1734_s25   ;;  %s1281_s24 = sphi %s1350_s24, %s1733_s24  }
   0xb   : > { %s1375_s30 = sadd.s32 1, %s1293_s27   ;;  %s31_s8 = sadd.s32 1, %s1289_s26 }
   0xc   : > { %s28_s9 = ssub.s32 %s1293_s27, %s1375_s30  ;;  %p38_p0 = scmp.ne.s32.totalorder %s1289_s26, %s1285_s25 }
   0xd   : > { %p29_p1 = scmp.eq.s32.totalorder %s28_s9, 0  ;;  %p39_p2 = scmp.eq.s32.totalorder %s1293_s27, 0 }
   0xe   : > { %p157_p3 = scmp.eq.s32.totalorder %s1371_s28, 1  ;;  %p162_p4 = scmp.ne.s32.totalorder %s1285_s25, %s1281_s24 }
   0xf   : > { %s1387_s10 = scalar_select %p29_p1, %s1289_s26, %s31_s8  }
  0x10   : > { %p40_p5 = por %p39_p2, %p38_p0  ;;  %p1389_p6 = por %p157_p3, %p38_p0 }
  0x11   : > { %p163_p7 = scmp.eq.s32.totalorder %s1719_s29, 1  ;;  %p1009_p9 = scmp.ge.s32.totalorder %s1293_s27, 2 }
  0x13   : > { %p1395_p8 = por %p163_p7, %p162_p4  ;;  %240 = sbr.rel (%p1009_p9) target bundleno = 35 (0x23), region = 28 }
  0x18   : > { %243 = sbr.rel (!%p40_p5) target bundleno = 35 (0x23), region = 32  ;;  %s245_s13 = sand.u32 (%p40_p5), 1, %s1289_s26  }
  0x19   : > { %s1011_s14 = sshll.u32 (%p40_p5), %s1293_s27, 3  ;;  %s1010_s15 = sshll.u32 (%p40_p5), %s245_s13, 4 }
  0x1a   : > { %s1726_s0 = sld [smem:[#allocation10_spill]] (%p40_p5)  ;;  %s247_s19 = scalar_lea.vmem (%p40_p5), [#allocation2], %s1010_s15 }
  0x20   : > { %s249_s18 = scalar_lea.vmem %s1726_s0, %s1011_s14 }
  0x21   : > { %v280_v0 = vld [vmem:[%s249_s18] sm:$0xff]  ;;  %v282_v1 = vld [vmem:[%s249_s18 + $0x10] sm:$0xff] }
  0x22   : > { %281 = vst [vmem:[%s247_s19] sm:$0xff] %v280_v0  ;;  %283 = vst [vmem:[%s247_s19 + $0x8] sm:$0xff] %v282_v1 }
  0x23 PF: > { %p1012_p10 = scmp.ge.s32.totalorder %s1293_s27, 1  ;;  %p297_p11 = scmp.lt.s32.totalorder %s1293_s27, 3 }
  0x25   : > { %p298_p12 = pnand %p1012_p10, %p297_p11 }
  0x26   : > { %s1017_s20 = sshll.u32 (!%p298_p12), %s1371_s28, 4  ;;  %s1727_s1 = sld [smem:[#allocation11_spill]] (!%p298_p12) }
  0x27   : > { %301 = sbr.rel (%p298_p12) target bundleno = 398 (0x18e), region = 74  ;;  %p351_p13 = scmp.lt.s32.totalorder (!%p298_p12), %s1017_s20, 31 }
  0x28   : > { %s1728_s2 = sld [smem:[#allocation12_spill]] (!%p298_p12)  ;;  %s304_s22 = sand.u32 (!%p298_p12), 1, %s1285_s25  }
  0x29   : > { %s1729_s3 = sld [smem:[#allocation13_spill]] (!%p298_p12)  ;;  %s1483_s23 = sshll.u32 (!%p298_p12), %s304_s22, 4 }
  0x2a   : > { %s306_s8 = scalar_lea.vmem (!%p298_p12), [#allocation2], %s1483_s23  ;;  %s1568_s13 = sshll.u32 (!%p298_p12), %s1371_s28, 7 }
  0x2b   : > { %s335_s14 = scalar_lea.vmem (!%p298_p12), [#allocation3], %s1483_s23  ;;  %s1586_s21 = scalar_lea.vmem (!%p298_p12), [#allocation7], %s1483_s23 }
  0x2c   : > { %v1295_v2 = vmov 0.0   ;;  %vm1296_vm0 = vmmov 0   ;;  %v562_v3 = vld [vmem:[%s1715_s4] sm:$0x3f]  ;;  %v511_v4 = vld [vmem:[%s1727_s1 + $0x8] sm:$0xff]  ;;  %v1297_v5 = vmov 0   ;;  %s1593_s18 = scalar_lea.hbm %s1717_s6, %s1568_s13 }
  0x2d   : > { %1067 = vmatprep.subr.mxu0 %v1295_v2  ;;  %1099 = vmatprep.mubr.msk.f32.mxu0 %vm1296_vm0, %v1295_v2  ;;  %s1738_s20 = smov (!%p351_p13, %s1017_s20), 31  ;;  %v510_v6 = vld [vmem:[%s1727_s1] sm:$0xff]  ;;  %v512_v7 = vld [vmem:[%s1727_s1 + $0x10] sm:$0x1f]  ;;  %vm568_vm1 = vcmask 261120   ;;  %vm364_vm2 = vcmask 1042432  }
  0x2e   : > { %1167 = vset.pattern.permute.xlu0 %v1297_v5  ;;  %1168 = vset.pattern.permute.xlu1 %v1297_v5  ;;  %s1018_s16 = sshll.u32 %s1738_s20, 3  ;;  %v1488_v25 = vld [vmem:[%s306_s8] sm:$0xff]  ;;  %v1298_v36 = vmov 2102212464   ;;  %v1299_v38 = vmov 920167782   ;;  %s1581_s20 = scalar_lea.hbm %s1716_s5, %s1568_s13 }
  0x2f   : > { %565 = vperm.xlu0 %1167, %v562_v3   ;;  %525 = vperm.xlu1 %1168, %v511_v4   ;;  %s1427_s19 = scalar_lea.vmem %s1728_s2, %s1018_s16  ;;  %v545_v24 = vld [vmem:[%s1729_s3] sm:$0x3f]  ;;  %v1019_v26 = vadd.f32 -1.5707964, %v1488_v25  ;;  %v362_v27 = vrot.slane %v1488_v25, 3  ;;  %vm702_vm0 = vcmask 1040384  }
  0x30   : > { %v561_v8 = vld [vmem:[%s1427_s19 + $0x78] sm:$0xff]  ;;  %v560_v9 = vld [vmem:[%s1427_s19 + $0x70] sm:$0xff]  ;;  %v559_v10 = vld [vmem:[%s1427_s19 + $0x68] sm:$0xff]  ;;  %v1300_v43 = vmov 1326507024   ;;  %s836_s15 = sshll.u32 %s335_s14, 4  ;;  %s1583_s15 = int_to_ptr.vmem [resolvable:$true] %s836_s15 }
  0x31   : > { %1068 = vmatpush3.xpose.msk.msra.mxu0 %vm568_vm1, %v561_v8  ;;  %v558_v11 = vld [vmem:[%s1427_s19 + $0x60] sm:$0xff]  ;;  %v557_v12 = vld [vmem:[%s1427_s19 + $0x58] sm:$0xff]  ;;  %v556_v13 = vld [vmem:[%s1427_s19 + $0x50] sm:$0xff]  ;;  %v1492_v28 = vsel %vm364_vm2, %v362_v27, %v1019_v26  ;;  %v1301_v45 = vmov 683565275   ;;  %vm697_vm2 = vcmask 1046528  }
  0x32   : > { %1069 = vmatprep.subr.mxu0 %v1295_v2  ;;  %v555_v14 = vld [vmem:[%s1427_s19 + $0x48] sm:$0xff]  ;;  %v554_v15 = vld [vmem:[%s1427_s19 + $0x40] sm:$0xff]  ;;  %v553_v16 = vld [vmem:[%s1427_s19 + $0x38] sm:$0xff]  ;;  %v369_v29 = vand.u32 2139095040, %v1492_v28  ;;  %v366_v40 = vand.u32 2147483647, %v1492_v28  ;;  %vm458_vm15 = vweird.f32 %v1492_v28 }
  0x33   : > { %515 = vperm.xlu0 %1167, %v510_v6   ;;  %536 = vperm.xlu1 %1168, %v512_v7   ;;  %v552_v17 = vld [vmem:[%s1427_s19 + $0x30] sm:$0xff]  ;;  %v551_v18 = vld [vmem:[%s1427_s19 + $0x28] sm:$0xff]  ;;  %v550_v19 = vld [vmem:[%s1427_s19 + $0x20] sm:$0xff]  ;;  %v1302_v47 = vmov 2475754826   ;;  %vm368_vm10 = vcmp.lt.s32.totalorder %v1492_v28, 0 }
  0x34   : > { %v549_v20 = vld [vmem:[%s1427_s19 + $0x18] sm:$0xff]  ;;  %v548_v21 = vld [vmem:[%s1427_s19 + $0x10] sm:$0xff]  ;;  %v547_v22 = vld [vmem:[%s1427_s19 + $0x8] sm:$0xff]  ;;  %v370_v30 = vshrl.u32 %v369_v29, 23  ;;  %v1303_v50 = vmov 2131351028  }
  0x35   : > { %1070 = vmatpush3.xpose.msk.msra.mxu0 %vm568_vm1, %v560_v9  ;;  %v546_v23 = vld [vmem:[%s1427_s19] sm:$0xff]  ;;  %v373_v55 = vand.u32 8388607, %v366_v40  ;;  %vm367_vm11 = vcmp.le.f32.partialorder %v366_v40, 0.7853982  ;;  %s1572_s16 = scalar_lea.vmem [#allocation5], %s1483_s23 }
  0x36   : > { %1071 = vmatprep.subr.mxu0 %v1295_v2  ;;  %v1020_v31 = vadd.s32 4294967169, %v370_v30  ;;  %s851_s17 = sshll.u32 %s1572_s16, 4  ;;  %s1599_s19 = scalar_lea.sflag [#allocation4], %s304_s22  ;;  %s1595_s17 = int_to_ptr.vmem [resolvable:$true] %s851_s17 }
  0x37   : > { %v374_v61 = vor.u32 8388608, %v373_v55  ;;  %s1177_s23 = scalar_lea.vmem %s1583_s15, 256 }
  0x38   : > { %v376_v32 = vadd.s32 1, %v1020_v31  ;;  %p1178_p0 = scmp.ne.s32.totalorder %s1583_s15, %s1177_s23 }
  0x39   : > { %1072 = vmatpush3.xpose.msk.msra.mxu0 %vm568_vm1, %v559_v10  ;;  %v414_v3 = vshll.u32 %v374_v61, 8 }
  0x3a   : > { %1073 = vmatprep.subr.mxu0 %v1295_v2  ;;  %vm377_vm3 = vcmp.gt.s32.totalorder %v376_v32, 0  ;;  %p1179_p1 = pnand %p1178_p0, %p1389_p6 }
  0x3b   : > { %v378_v33 = vsel %vm377_vm3, %v376_v32, 0 }
  0x3c   : > { %v380_v34 = vand.u32 31, %v378_v33  ;;  %v379_v41 = vshrl.u32 %v378_v33, 5  ;;  %p1180_p2 = pneg %p1179_p1 }
  0x3d   : > { %1074 = vmatpush3.xpose.msk.msra.mxu0 %vm568_vm1, %v558_v11 }
  0x3e   : > { %1075 = vmatprep.subr.mxu0 %v1295_v2  ;;  %v381_v35 = vsub.s32 32, %v380_v34  ;;  %v392_v37 = vshll.u32 %v1298_v36, %v380_v34  ;;  %v395_v42 = vshll.u32 %v1299_v38, %v380_v34  ;;  %v383_v46 = vshll.u32 %v1301_v45, %v380_v34 }
  0x3f   : > { %v386_v48 = vshll.u32 %v1302_v47, %v380_v34  ;;  %v389_v52 = vshll.u32 %v1303_v50, %v380_v34  ;;  %vm401_vm4 = vcmp.lt.s32.totalorder %v379_v41, 4  ;;  %vm398_vm5 = vcmp.lt.s32.totalorder %v379_v41, 1 }
  0x40   : > { %v393_v39 = vshrl.u32 %v1299_v38, %v381_v35  ;;  %v396_v44 = vshrl.u32 %v1300_v43, %v381_v35  ;;  %v384_v49 = vshrl.u32 %v1302_v47, %v381_v35  ;;  %v387_v51 = vshrl.u32 %v1303_v50, %v381_v35 }
  0x41   : > { %1076 = vmatpush3.xpose.msk.msra.mxu0 %vm568_vm1, %v557_v12  ;;  %v390_v53 = vshrl.u32 %v1298_v36, %v381_v35  ;;  %vm400_vm6 = vcmp.lt.s32.totalorder %v379_v41, 3  ;;  %vm399_vm7 = vcmp.lt.s32.totalorder %v379_v41, 2  ;;  %v382_v8 = vshrl.u32 %v1301_v45, %v381_v35 }
  0x42   : > { %1077 = vmatprep.subr.mxu0 %v1295_v2  ;;  %v394_v54 = vor.u32 %v393_v39, %v392_v37  ;;  %v397_v56 = vor.u32 %v396_v44, %v395_v42  ;;  %v385_v57 = vor.u32 %v384_v49, %v383_v46  ;;  %v388_v58 = vor.u32 %v387_v51, %v386_v48 }
  0x43   : > { %v391_v59 = vor.u32 %v390_v53, %v389_v52  ;;  %v358_v52 = vmul.f32 1.442695, %v1488_v25 }
  0x44   : > { %v407_v60 = vsel %vm401_vm4, %v394_v54, 920167782  ;;  %v411_v62 = vsel %vm401_vm4, %v397_v56, 1326507024  ;;  %v406_v63 = vsel %vm398_vm5, %v385_v57, %v388_v58  ;;  %v402_v12 = vsel %vm398_vm5, %v382_v8, %v385_v57 }
  0x45   : > { %1078 = vmatpush3.xpose.msk.msra.mxu0 %vm568_vm1, %v556_v13  ;;  %v408_v0 = vsel %vm400_vm6, %v391_v59, %v407_v60  ;;  %v410_v1 = vsel %vm398_vm5, %v388_v58, %v391_v59  ;;  %v403_v11 = vsel %vm401_vm4, %v391_v59, 2102212464  ;;  %v518_v56 = vlaneseq }
  0x46   : > { %1079 = vmatprep.subr.mxu0 %v1295_v2  ;;  %v409_v4 = vsel %vm399_vm7, %v406_v63, %v408_v0  ;;  %v404_v13 = vsel %vm400_vm6, %v388_v58, %v403_v11 }
  0x47   : > { %v1506_v6 = vmul.u32.u64.low %v414_v3, %v409_v4  ;;  %v1507_v7 = vmul.u32.u64.high %v414_v3, %v409_v4, %v1506_v6  ;;  %v1526_v58 = vshrl.u32 %v518_v56, 7 }
  0x49   : > { %1080 = vmatpush3.xpose.msk.msra.mxu0 %vm568_vm1, %v555_v14  ;;  %v405_v14 = vsel %vm399_vm7, %v402_v12, %v404_v13  ;;  %v1532_v63 = vsub.s32 1, %v1526_v58  ;;  %v520_v13 = vsub.s32 0, %v1526_v58 }
  0x4a   : > { %1081 = vmatprep.subr.mxu0 %v1295_v2 }
  0x4d   : > { %1082 = vmatpush3.xpose.msk.msra.mxu0 %vm568_vm1, %v554_v15  ;;  %v424_v15 = vadd.s32 1, %v1507_v7 }
  0x4e   : > { %1083 = vmatprep.subr.mxu0 %v1295_v2 }
  0x51   : > { %1084 = vmatpush3.xpose.msk.msra.mxu0 %vm568_vm1, %v553_v16  ;;  %v421_v16 = vmul.u32 %v414_v3, %v405_v14 }
  0x52   : > { %1085 = vmatprep.subr.mxu0 %v1295_v2 }
  0x55   : > { %1086 = vmatpush3.xpose.msk.msra.mxu0 %vm568_vm1, %v552_v17 }
  0x56   : > { %1087 = vmatprep.subr.mxu0 %v1295_v2 }
  0x59   : > { %1088 = vmatpush3.xpose.msk.msra.mxu0 %vm568_vm1, %v551_v18 }
  0x5a   : > { %1089 = vmatprep.subr.mxu0 %v1295_v2 }
  0x5d   : > { %1090 = vmatpush3.xpose.msk.msra.mxu0 %vm568_vm1, %v550_v19 }
  0x5e   : > { %1091 = vmatprep.subr.mxu0 %v1295_v2 }
  0x61   : > { %1092 = vmatpush3.xpose.msk.msra.mxu0 %vm568_vm1, %v549_v20 }
  0x62   : > { %1093 = vmatprep.subr.mxu0 %v1295_v2 }
  0x65   : > { %1094 = vmatpush3.xpose.msk.msra.mxu0 %vm568_vm1, %v548_v21 }
  0x66   : > { %1095 = vmatprep.subr.mxu0 %v1295_v2 }
  0x69   : > { %1096 = vmatpush3.xpose.msk.msra.mxu0 %vm568_vm1, %v547_v22 }
  0x6a   : > { %1097 = vmatprep.subr.mxu0 %v1295_v2  ;;  %v412_v2 = vsel %vm400_vm6, %v394_v54, %v411_v62 }
  0x6b   : > { %v413_v5 = vsel %vm399_vm7, %v410_v1, %v412_v2 }
  0x6c   : > { %v1509_v9 = vmul.u32.u64.low %v414_v3, %v413_v5  ;;  %v1510_v10 = vmul.u32.u64.high %v414_v3, %v413_v5, %v1509_v9 }
  0x6d   : > { %1098 = vmatpush3.xpose.msk.msra.mxu0 %vm568_vm1, %v546_v23 }
  0x6e   : > { %vm423_vm8 = vc.u32 %v1510_v10, %v1506_v6  ;;  %v422_v31 = vadd.s32 %v1506_v6, %v1510_v10 }
  0x6f   : > { %v425_v17 = vsel %vm423_vm8, %v424_v15, %v1507_v7 }
  0x70   : > { %1100 = vmatmul.mubr.msk.f32.vlgmr.msra.gmra.mxu0 %vm568_vm1, %v545_v24  ;;  %v426_v18 = vadd.s32 %v425_v17, %v421_v16  ;;  %vm714_vm1 = vcmask 1041408  }
  0x72   : > { %v427_v19 = vadd.s32 536870912, %v426_v18 }
  0x74   : > { %v428_v20 = vshrl.u32 %v427_v19, 30 }
  0x76   : > { %v429_v21 = vshll.u32 %v428_v20, 30  ;;  %v452_v46 = vsub.s32 4, %v428_v20 }
  0x78   : > { %v430_v22 = vsub.s32 %v426_v18, %v429_v21  ;;  %v453_v47 = vsel %vm368_vm10, %v452_v46, %v428_v20 }
  0x79   : > { %v455_v48 = vsel %vm367_vm11, 0, %v453_v47 }
  0x7a   : > { %v432_v23 = vsub.s32 0, %v430_v22  ;;  %v459_v51 = vand.u32 3, %v455_v48 }
  0x7c   : > { %v1021_v24 = vmin.u32 %v432_v23, %v430_v22  ;;  %vm461_vm12 = vcmp.eq.s32.totalorder %v459_v51, 0  ;;  %vm464_vm13 = vcmp.eq.s32.totalorder %v459_v51, 2  ;;  %vm460_vm14 = vcmp.lt.s32.totalorder %v459_v51, 2 }
  0x7e   : > { %v434_v26 = vclz %v1021_v24 }
  0x80   : > { %v1022_v27 = vadd.s32 4294967294, %v434_v26 }
  0x82   : > { %vm1023_vm9 = vcmp.lt.s32.totalorder %v1022_v27, 0 }
  0x83   : > { %v437_v29 = vsel %vm1023_vm9, 0, %v1022_v27 }
  0x84   : > { %v442_v30 = vsub.s32 4294967266, %v437_v29  ;;  %v438_v32 = vsub.s32 32, %v437_v29  ;;  %v439_v34 = vshll.u32 %v430_v22, %v437_v29 }
  0x86   : > { %v443_v33 = vadd.s32 127, %v442_v30  ;;  %v440_v35 = vshrl.u32 %v422_v31, %v438_v32 }
  0x88   : > { %v444_v36 = vshll.u32 %v443_v33, 23  ;;  %v441_v37 = vor.u32 %v440_v35, %v439_v34 }
  0x8a   : > { %v445_v38 = vor.u32 4788187, %v444_v36  ;;  %v448_v41 = vcvt.s32.f32 %v441_v37 }
  0x8c   : > { %v446_v39 = vand.u32 2147483647, %v445_v38 }
  0x8e   : > { %v449_v42 = vmul.f32 %v448_v41, %v446_v39 }
  0x90   : > { %v450_v43 = vxor.u32 2147483648, %v449_v42 }
  0x92   : > { %v451_v44 = vsel %vm368_vm10, %v450_v43, %v449_v42 }
  0x93   : > { %v454_v45 = vsel %vm367_vm11, %v1492_v28, %v451_v44  ;;  %v541_v28 = vsub.s32 2, %v1526_v58  ;;  %v731_v44 = vsub.s32 3, %v1526_v58 }
  0x94   : > { %1169 = vcosq.f32 %v454_v45 }
  0x95   : > { %1171 = vsinq.f32 %v454_v45 }
  0x96   : > { %1173 = vpow2.f32 %v358_v52  ;;  %v791_v52 = vsub.s32 4, %v1526_v58 }
  0xa1   : > { %v1170_v49 = vpop.eup %1169 }
  0xa2   : > { %v1172_v50 = vpop.eup %1171  ;;  %v465_v54 = vxor.u32 2147483648, %v1170_v49 }
  0xa3   : > { %v462_v53 = vxor.u32 2147483648, %v1172_v50  ;;  %v1174_v1 = vpop.eup %1173 }
  0xa4   : > { %v466_v55 = vsel %vm464_vm13, %v465_v54, %v1172_v50  ;;  %v531_v7 = vrot.slane %v1174_v1, %v1532_v63  ;;  %v542_v15 = vrot.slane %v1174_v1, %v541_v28  ;;  %v521_v22 = vrot.slane %v1174_v1, %v520_v13 }
  0xa5   : > { %v463_v40 = vsel %vm461_vm12, %v1170_v49, %v462_v53  ;;  %v747_v54 = vsub.s32 6, %v1526_v58 }
  0xa6   : > { %v467_v57 = vsel %vm460_vm14, %v463_v40, %v466_v55  ;;  %v777_v40 = vsub.s32 7, %v1526_v58 }
  0xa7   : > { %v1528_v59 = vsel %vm458_vm15, nan, %v467_v57 }
  0xa8   : > { %v473_v62 = vrot.slane %v1528_v59, 1  ;;  %v496_v2 = vrot.slane %v1528_v59, 4  ;;  %v470_v5 = vrot.slane %v1528_v59, 2  ;;  %v485_v10 = vrot.slane %v1528_v59, 5 }
  0xa9   : > { %v488_v11 = vrot.slane %v1528_v59, 7  ;;  %v481_v14 = vsub.f32 0.0, %v1528_v59  ;;  %v482_v32 = vrot.slane %v1528_v59, 6  ;;  %v792_v58 = vrot.slane %v1528_v59, %v791_v52 }
  0xaa   : > { %v566_v60 = vpop.permute.xlu0 %565  ;;  %v1538_v6 = vmul.f32 %v473_v62, %v1528_v59  ;;  %v526_v8 = vpop.permute.xlu1 %525  ;;  %v498_v12 = vmul.f32 %v496_v2, %v1528_v59  ;;  %v472_v27 = vmul.f32 %v470_v5, %v1528_v59  ;;  %v487_v34 = vmul.f32 %v485_v10, %v1528_v59 }
  0xab   : > { %v533_v17 = vmul.f32 %v531_v7, %v526_v8  ;;  %v509_v24 = vmul.f32 %v496_v2, %v481_v14  ;;  %v543_v26 = vmul.f32 %v542_v15, %v526_v8  ;;  %v495_v36 = vmul.f32 %v488_v11, %v1528_v59 }
  0xac   : > { %v476_v16 = vmul.f32 %v1538_v6, %v470_v5  ;;  %v490_v20 = vmul.f32 %v488_v11, %v1538_v6  ;;  %v499_v21 = vmul.f32 %v498_v12, %v485_v10  ;;  %v504_v23 = vmul.f32 %v498_v12, %v470_v5 }
  0xad   : > { %v704_v30 = vrot.slane %v533_v17, 7  ;;  %v786_v39 = vrot.slane %v509_v24, %v1532_v63  ;;  %v715_v42 = vrot.slane %v543_v26, 6  ;;  %v484_v45 = vmul.f32 %v482_v32, %v481_v14 }
  0xae   : > { %v516_v9 = vpop.permute.xlu0 %515  ;;  %v537_v19 = vpop.permute.xlu1 %536  ;;  %v478_v29 = vrot.slane %v476_v16, 3  ;;  %v492_v35 = vrot.slane %v490_v20, 3  ;;  %v501_v37 = vrot.slane %v499_v21, 5  ;;  %v506_v38 = vrot.slane %v504_v23, 5 }
  0xaf   : > { %v532_v18 = vmul.f32 %v531_v7, %v516_v9  ;;  %v544_v33 = vmul.f32 %v542_v15, %v537_v19  ;;  %v522_v43 = vmul.f32 %v521_v22, %v516_v9  ;;  %v762_v2 = vrot.slane %v1538_v6, %v520_v13 }
  0xb0   : > { %v480_v41 = vsub.f32 %v472_v27, %v478_v29  ;;  %v494_v48 = vadd.f32 %v492_v35, %v487_v34  ;;  %v503_v49 = vadd.f32 %v501_v37, %v495_v36  ;;  %v508_v53 = vsub.f32 %v472_v27, %v506_v38  ;;  %v1041_v35 = vld [vmem:[%s306_s8 + $0x8] ss:$0 sm:$0xff]  ;;  %s1304_s8 = smov [#allocation3]  }
  0xb1   : > { %v703_v31 = vrot.slane %v532_v18, 7  ;;  %v716_v50 = vrot.slane %v544_v33, 6  ;;  %v748_v8 = vrot.slane %v1488_v25, %v747_v54  ;;  %v778_v9 = vrot.slane %v1488_v25, %v777_v40  ;;  %s1181_s0 = sshll.u32 %s1304_s8, 4  ;;  %s1182_s0 = int_to_ptr.vmem [resolvable:$false] %s1181_s0 }
  0xb2   : > { %v726_v55 = vrot.slane %v480_v41, %v520_v13  ;;  %v756_v1 = vrot.slane %v503_v49, %v731_v44  ;;  %v770_v5 = vrot.slane %v508_v53, %v731_v44  ;;  %s1183_s29 = scalar_lea.vmem %s1182_s0, 512  ;;  %p1184_p3 = scmp.lt.s32.totalorder %s1583_s15, %s1182_s0 }
  0xb3   : > { %v705_v47 = vsel %vm702_vm0, %v703_v31, %v704_v30  ;;  %v717_v62 = vsel %vm714_vm1, %v715_v42, %v716_v50  ;;  %p1185_p4 = scmp.lt.s32.totalorder %s1183_s29, %s1177_s23 }
  0xb5   : > { %p1186_p5 = por %p1185_p4, %p1184_p3 }
  0xb7   : > { %p1187_p7 = pnand %p1186_p5, %p1180_p2 }
 0x130   : > { %v686_v61 = vpop.f32.mrf.mxu0 }
 0x131   : > { %v687_v0 = vadd.f32 %v686_v61, %v566_v60  ;;  %v732_v61 = vrot.slane %v484_v45, %v731_v44 }
 0x132   : > { %v1101_v3 = vpop.f32.mrf.mxu0 }
 0x133   : > { %v690_v4 = vmul.f32 0.5, %v687_v0  ;;  %v740_v0 = vrot.slane %v494_v48, %v520_v13 }
 0x135   : > { %1175 = vtanh.f32 %v690_v4 }
 0x142   : > { %v1176_v46 = vpop.eup %1175 }
 0x143   : > { %v692_v51 = vmul.f32 0.5, %v1176_v46 }
 0x145   : > { %v693_v56 = vmul.f32 %v692_v51, %v521_v22  ;;  %v699_v57 = vmul.f32 %v692_v51, %v531_v7  ;;  %v711_v60 = vmul.f32 %v692_v51, %v542_v15  ;;  %v800_v7 = vrot.slane %v1538_v6, %v1532_v63 }
 0x147   : > { %v695_v3 = vrot.slane %v693_v56, 1  ;;  %v708_v4 = vrot.slane %v699_v57, 3  ;;  %v720_v28 = vrot.slane %v711_v60, 5 }
 0x149   : > { %v788_v10 = vmul.f32 %v786_v39, %v695_v3  ;;  %v698_v11 = vsel %vm697_vm2, %v522_v43, %v695_v3  ;;  %v710_v12 = vsel %vm697_vm2, %v705_v47, %v708_v4  ;;  %v722_v13 = vsel %vm697_vm2, %v717_v62, %v720_v28 }
 0x14a   : > { %v727_v14 = vmul.f32 %v726_v55, %v698_v11  ;;  %v728_v15 = vmul.f32 %v726_v55, %v695_v3  ;;  %v733_v16 = vmul.f32 %v732_v61, %v710_v12  ;;  %v734_v17 = vmul.f32 %v732_v61, %v708_v4 }
 0x14b   : > { %v741_v25 = vmul.f32 %v740_v0, %v722_v13  ;;  %v742_v18 = vmul.f32 %v740_v0, %v720_v28  ;;  %v757_v59 = vmul.f32 %v756_v1, %v698_v11  ;;  %v758_v19 = vmul.f32 %v756_v1, %v695_v3 }
 0x14c   : > { %v735_v20 = vadd.f32 %v733_v16, %v727_v14  ;;  %v736_v63 = vadd.f32 %v734_v17, %v728_v15  ;;  %v763_v6 = vmul.f32 %v762_v2, %v710_v12  ;;  %v764_v21 = vmul.f32 %v762_v2, %v708_v4 }
 0x14d   : > { %v771_v22 = vmul.f32 %v770_v5, %v722_v13  ;;  %v772_v23 = vmul.f32 %v770_v5, %v720_v28  ;;  %v787_v24 = vmul.f32 %v786_v39, %v698_v11  ;;  %v793_v26 = vmul.f32 %v792_v58, %v710_v12 }
 0x14e   : > { %v743_v27 = vadd.f32 %v741_v25, %v735_v20  ;;  %v744_v29 = vadd.f32 %v742_v18, %v736_v63  ;;  %v765_v30 = vadd.f32 %v763_v6, %v757_v59  ;;  %v766_v31 = vadd.f32 %v764_v21, %v758_v19 }
 0x14f   : > { %v794_v32 = vmul.f32 %v792_v58, %v708_v4  ;;  %v795_v33 = vadd.f32 %v793_v26, %v787_v24  ;;  %v801_v34 = vmul.f32 %v800_v7, %v722_v13  ;;  %v802_v42 = vmul.f32 %v800_v7, %v720_v28 }
 0x150   : > { %v749_v36 = vadd.f32 %v748_v8, %v743_v27  ;;  %v773_v37 = vadd.f32 %v771_v22, %v765_v30  ;;  %v774_v38 = vadd.f32 %v772_v23, %v766_v31  ;;  %v750_v39 = vadd.f32 %v748_v8, %v744_v29 }
 0x151   : > { %v796_v41 = vadd.f32 %v794_v32, %v788_v10  ;;  %v803_v43 = vadd.f32 %v801_v34, %v795_v33 }
 0x152   : > { %v779_v44 = vadd.f32 %v778_v9, %v773_v37  ;;  %v780_v45 = vadd.f32 %v778_v9, %v774_v38  ;;  %751 = vst [vmem:[%s335_s14] sm:$0xff] %v749_v36  ;;  %752 = vst [vmem:[%s335_s14 + $0x8] sm:$0x1] %v750_v39 }
 0x153   : > { %v804_v46 = vadd.f32 %v802_v42, %v796_v41  ;;  %v809_v47 = vadd.f32 %v1041_v35, %v803_v43 }
 0x154   : > { %1190 = shalt.err (!%p1187_p7)
}
 0x155   : > { %s1191_s22 = scalar_lea.hbm %s1581_s20, 256  ;;  %s1195_s8 = scalar_lea.hbm %s1716_s5, 512 }
 0x156   : > { %p1192_p10 = scmp.ne.s32.totalorder %s1581_s20, %s1191_s22  ;;  %p1196_p13 = scmp.lt.s32.totalorder %s1581_s20, %s1716_s5 }
 0x157   : > { %p1197_p0 = scmp.lt.s32.totalorder %s1195_s8, %s1191_s22 }
 0x158   : > { %p1193_p11 = pnand %p1192_p10, %p1389_p6 }
 0x159   : > { %p1198_p1 = por %p1197_p0, %p1196_p13 }
 0x15a   : > { %p1194_p12 = pneg %p1193_p11 }
 0x15c   : > { %p1199_p2 = pnand %p1198_p1, %p1194_p12 }
 0x15e   : > { %1202 = shalt.err (!%p1199_p2)
}
 0x15f   : > { %s1305_s0 = smov 128   ;;  %s1306_s1 = smov 256   ;;  %781 = vst [vmem:[%s1572_s16] sm:$0xff] %v779_v44  ;;  %782 = vst [vmem:[%s1572_s16 + $0x8] sm:$0x1] %v780_v45  ;;  %v810_v48 = vadd.f32 %v1041_v35, %v804_v46 }
 0x160   : > { %s1307_s2 = smov 8   ;;  %s1631_s22 = scalar_lea.hbm %s1718_s7, %s1568_s13  ;;  %811 = vst [vmem:[%s1586_s21] sm:$0xff] %v809_v47 }
 0x161   : > { %1106 = dma.vmem_to_hbm [thread:$0]  (%p1389_p6), %s1583_s15, 256, %s1581_s20, %s1599_s19, %s1305_s0, %s1306_s1, %s1307_s2  }
 0x162   : > { %s1730_s9 = sshll.u32 %s1586_s21, 4  ;;  %s1731_s14 = sand.u32 1, %s1371_s28   ;;  %s1635_s9 = int_to_ptr.vmem [resolvable:$true] %s1730_s9 }
 0x163   : > { %s1640_s8 = scalar_lea.sflag [#allocation6], %s1731_s14  ;;  %s1203_s3 = scalar_lea.vmem %s1595_s17, 256 }
 0x164   : > { %p1204_p3 = scmp.ne.s32.totalorder %s1595_s17, %s1203_s3  ;;  %s1308_s15 = smov [#allocation5]  }
 0x165   : > { %s1207_s16 = sshll.u32 %s1308_s15, 4  ;;  %s1208_s16 = int_to_ptr.vmem [resolvable:$false] %s1207_s16 }
 0x166   : > { %p1205_p4 = pnand %p1204_p3, %p1389_p6  ;;  %s1209_s20 = scalar_lea.vmem %s1208_s16, 512 }
 0x167   : > { %p1210_p7 = scmp.lt.s32.totalorder %s1595_s17, %s1208_s16  ;;  %p1211_p10 = scmp.lt.s32.totalorder %s1209_s20, %s1203_s3 }
 0x168   : > { %p1206_p5 = pneg %p1205_p4 }
 0x169   : > { %p1212_p11 = por %p1211_p10, %p1210_p7 }
 0x16b   : > { %p1213_p12 = pnand %p1212_p11, %p1206_p5 }
 0x16d   : > { %1216 = shalt.err (!%p1213_p12)
}
 0x16e   : > { %s1217_s28 = scalar_lea.hbm %s1593_s18, 256  ;;  %s1221_s23 = scalar_lea.hbm %s1717_s6, 512 }
 0x16f   : > { %p1218_p13 = scmp.ne.s32.totalorder %s1593_s18, %s1217_s28  ;;  %p1222_p2 = scmp.lt.s32.totalorder %s1593_s18, %s1717_s6 }
 0x170   : > { %p1223_p3 = scmp.lt.s32.totalorder %s1221_s23, %s1217_s28 }
 0x171   : > { %p1219_p0 = pnand %p1218_p13, %p1389_p6 }
 0x172   : > { %p1224_p4 = por %p1223_p3, %p1222_p2 }
 0x173   : > { %p1220_p1 = pneg %p1219_p0 }
 0x175   : > { %p1225_p5 = pnand %p1224_p4, %p1220_p1 }
 0x177   : > { %1228 = shalt.err (!%p1225_p5)
}
 0x178   : > { %1107 = dma.vmem_to_hbm [thread:$0]  (%p1389_p6), %s1595_s17, 256, %s1593_s18, %s1640_s8, %s1305_s0, %s1306_s1, %s1307_s2  }
 0x179   : > { %812 = vst [vmem:[%s1586_s21 + $0x8] sm:$0x1] %v810_v48  ;;  %s1229_s3 = scalar_lea.vmem %s1635_s9, 256  ;;  %s1309_s15 = smov [#allocation7]  }
 0x17a   : > { %p1230_p7 = scmp.ne.s32.totalorder %s1635_s9, %s1229_s3  ;;  %s1233_s16 = sshll.u32 %s1309_s15, 4  ;;  %s1234_s16 = int_to_ptr.vmem [resolvable:$false] %s1233_s16 }
 0x17b   : > { %s1235_s20 = scalar_lea.vmem %s1234_s16, 512  ;;  %p1236_p12 = scmp.lt.s32.totalorder %s1635_s9, %s1234_s16 }
 0x17c   : > { %p1231_p10 = pnand %p1230_p7, %p1389_p6  ;;  %p1237_p13 = scmp.lt.s32.totalorder %s1235_s20, %s1229_s3 }
 0x17e   : > { %p1232_p11 = pneg %p1231_p10  ;;  %p1238_p0 = por %p1237_p13, %p1236_p12 }
 0x180   : > { %p1239_p1 = pnand %p1238_p0, %p1232_p11 }
 0x182   : > { %1242 = shalt.err (!%p1239_p1)
}
 0x183   : > { %s1243_s17 = scalar_lea.hbm %s1631_s22, 256  ;;  %s1247_s28 = scalar_lea.hbm %s1718_s7, 512 }
 0x184   : > { %p1244_p2 = scmp.ne.s32.totalorder %s1631_s22, %s1243_s17  ;;  %p1248_p5 = scmp.lt.s32.totalorder %s1631_s22, %s1718_s7 }
 0x185   : > { %p1249_p7 = scmp.lt.s32.totalorder %s1247_s28, %s1243_s17 }
 0x186   : > { %p1245_p3 = pnand %p1244_p2, %p1389_p6 }
 0x187   : > { %p1250_p10 = por %p1249_p7, %p1248_p5 }
 0x188   : > { %p1246_p4 = pneg %p1245_p3 }
 0x18a   : > { %p1251_p11 = pnand %p1250_p10, %p1246_p4 }
 0x18c   : > { %1254 = shalt.err (!%p1251_p11)
}
 0x18d   : > { %1108 = dma.vmem_to_hbm [thread:$0]  (%p1389_p6), %s1635_s9, 256, %s1631_s22, %s1640_s8, %s1305_s0, %s1306_s1, %s1307_s2  }
 0x18e PF: > { %s881_s23 = sand.u32 1, %s1281_s24   ;;  %p1113_p12 = pnand %p1009_p9, %p1395_p8 }
 0x18f   : > { %s882_s29 = scalar_lea.sflag [#allocation4], %s881_s23 }
 0x190   : > { %p1114_p13 = pneg %p1113_p12 }
 0x192   : > { %1272 = dma.done.wait (%p1114_p13), %s882_s29, 256  }
 0x193   : > { %1274 = vsyncadd (%p1114_p13), %s882_s29, 4294967040  ;;  %s1732_s11 = sadd.s32 4294967294, %s1293_s27  }
 0x194   : > { %s890_s14 = sand.u32 1, %s1732_s11  }
 0x195   : > { %s891_s3 = scalar_lea.sflag [#allocation6], %s890_s14 }
 0x196   : > { %1276 = dma.done.wait (%p1114_p13), %s891_s3, 512  }
 0x197   : > { %1278 = vsyncadd (%p1114_p13), %s891_s3, 4294966784  ;;  %p21_p6 = scmp.ge.s32.totalorder %s1375_s30, 4   ;;  %s1733_s24 = smov %s1285_s25 }
 0x198   : > { %s1734_s25 = smov %s1289_s26  ;;  %s1735_s26 = smov %s1387_s10 }
 0x199   : > { %s1736_s27 = smov %s1375_s30  ;;  %23 = sbr.rel (!%p21_p6) target bundleno = 10 (0xa), region = 153 }
 0x19e   :  { %905 = vsyncpa [#allocation4], 1 }
 0x19f   :  { %907 = vsyncpa [#allocation4 + $0x1], 1 }
 0x1a0   :  { %908 = vsyncpa [#allocation6], 1 }
 0x1a1   :  { %910 = vsyncpa [#allocation6 + $0x1], 1 }

</bundles_post_ra>
